<compile_context>
chip_gen: v7x
topology: tpu7x:2x2x1
jax: 0.10.0
libtpu: 0.0.40
codegen_flags: <defaults>
</compile_context>

<pallas_src>
import jax
import jax.numpy as jnp
from jax.experimental import pallas as pl
from jax.experimental.pallas import tpu as pltpu

LANE = 128     # TPU lane width (last-dim granularity)
SUBLANE = 8    # TPU sublane width


def _round_up(x, m):
    return ((x + m - 1) // m) * m


def _pad2d(a, rows, cols):
    r, c = a.shape
    return jnp.pad(a, ((0, rows - r), (0, cols - c)))


def _pick_tile(dim_p, cap=512):
    """Largest multiple of LANE that divides dim_p and is <= cap."""
    t = min(cap, dim_p)
    while dim_p % t:
        t -= LANE
    return max(t, LANE)


def _vmem_capacity_bytes():
    try:
        info = pltpu.get_tpu_info()
        cap = getattr(info, "vmem_capacity_bytes", None)
        if cap:
            return int(cap)
    except Exception:
        pass
    return 64 * 1024 * 1024   # conservative fallback (v7x per-TC VMEM)


# ---------------------------------------------------------------------------
# Path A: fully fused encoder — all k GCN layers in a single pallas_call.
#         No grid -> whole operands live once in VMEM (no double buffering);
#         the hidden activation never round-trips through HBM.
# ---------------------------------------------------------------------------
def _make_fused_encoder_kernel(num_layers, compute_dtype):
    def kernel(*refs):
        # refs = (a, x, w1, b1, ..., wk, bk, out)
        a = refs[0][...]
        h = refs[1][...]
        o_ref = refs[2 + 2 * num_layers]
        h_f32 = None
        for i in range(num_layers):
            w = refs[2 + 2 * i][...]
            b = refs[3 + 2 * i][...]
            # XW computed exactly once per layer; f32 MXU accumulation.
            xw = jnp.dot(h, w, preferred_element_type=jnp.float32)
            ah = jnp.dot(a, xw.astype(compute_dtype),
                         preferred_element_type=jnp.float32)
            h_f32 = jnp.maximum(ah + b, 0.0)          # bias + ReLU in f32
            h = h_f32.astype(compute_dtype)
        o_ref[...] = h_f32.astype(o_ref.dtype)
    return kernel


def _fused_encoder(a_p, x_p, params_p, compute_dtype, vmem_limit):
    n_p = a_p.shape[0]
    f_out_p = params_p[-1][0].shape[1]
    operands = [a_p, x_p]
    for (w, b) in params_p:
        operands += [w, b]
    return pl.pallas_call(
        _make_fused_encoder_kernel(len(params_p), compute_dtype),
        out_shape=jax.ShapeDtypeStruct((n_p, f_out_p), jnp.float32),
        compiler_params=pltpu.CompilerParams(vmem_limit_bytes=vmem_limit),
    )(*operands)


# ---------------------------------------------------------------------------
# Path B: tiled path for large graphs.
#   B1) narrow layers (f_in_p <= f_out_p): single kernel per layer,
#       Y = ReLU((A @ H) @ W + b) with A@H K-accumulated in f32 scratch and
#       the W multiply + bias + ReLU fused into the finalize branch.
#   B2) wide-input layers (f_in_p > f_out_p): XW = H @ W hoisted once
#       (K-tiled matmul, emits compute_dtype), then Y = ReLU(A @ XW + b).
# ---------------------------------------------------------------------------
def _agg_fused_w_kernel(a_ref, h_ref, w_ref, b_ref, o_ref, acc_ref):
    k = pl.program_id(1)

    @pl.when(k == 0)
    def _():
        acc_ref[...] = jnp.zeros_like(acc_ref)

    acc_ref[...] += jnp.dot(a_ref[...], h_ref[...],
                            preferred_element_type=jnp.float32)

    @pl.when(k == pl.num_programs(1) - 1)
    def _():
        y = jnp.dot(acc_ref[...].astype(w_ref.dtype), w_ref[...],
                    preferred_element_type=jnp.float32)
        o_ref[...] = jnp.maximum(y + b_ref[...], 0.0).astype(o_ref.dtype)


def _aggregate_fused_w(a_p, h, w, b, *, tile, out_dtype, vmem_limit):
    n_p = a_p.shape[0]
    f_in_p, f_out_p = w.shape
    return pl.pallas_call(
        _agg_fused_w_kernel,
        out_shape=jax.ShapeDtypeStruct((n_p, f_out_p), out_dtype),
        grid=(n_p // tile, n_p // tile),
        in_specs=[pl.BlockSpec((tile, tile), lambda i, k: (i, k)),
                  pl.BlockSpec((tile, f_in_p), lambda i, k: (k, 0)),
                  pl.BlockSpec((f_in_p, f_out_p), lambda i, k: (0, 0)),
                  pl.BlockSpec((1, f_out_p), lambda i, k: (0, 0))],
        out_specs=pl.BlockSpec((tile, f_out_p), lambda i, k: (i, 0)),
        scratch_shapes=[pltpu.VMEM((tile, f_in_p), jnp.float32)],
        compiler_params=pltpu.CompilerParams(
            dimension_semantics=("parallel", "arbitrary"),
            vmem_limit_bytes=vmem_limit),
    )(a_p, h, w, b)


def _matmul_kernel(x_ref, w_ref, o_ref, acc_ref):
    @pl.when(pl.program_id(2) == 0)
    def _():
        acc_ref[...] = jnp.zeros_like(acc_ref)

    acc_ref[...] += jnp.dot(x_ref[...], w_ref[...],
                            preferred_element_type=jnp.float32)

    @pl.when(pl.program_id(2) == pl.num_programs(2) - 1)
    def _():
        o_ref[...] = acc_ref[...].astype(o_ref.dtype)


def _tiled_matmul(x, w, *, tm, out_dtype, vmem_limit):
    m, kdim = x.shape
    _, n = w.shape
    tk = _pick_tile(kdim)
    tn = _pick_tile(n)
    return pl.pallas_call(
        _matmul_kernel,
        out_shape=jax.ShapeDtypeStruct((m, n), out_dtype),
        grid=(m // tm, n // tn, kdim // tk),
        in_specs=[pl.BlockSpec((tm, tk), lambda i, j, k: (i, k)),
                  pl.BlockSpec((tk, tn), lambda i, j, k: (k, j))],
        out_specs=pl.BlockSpec((tm, tn), lambda i, j, k: (i, j)),
        scratch_shapes=[pltpu.VMEM((tm, tn), jnp.float32)],
        compiler_params=pltpu.CompilerParams(
            dimension_semantics=("parallel", "parallel", "arbitrary"),
            vmem_limit_bytes=vmem_limit),
    )(x, w)


def _aggregate_kernel(a_ref, xw_ref, b_ref, o_ref, acc_ref):
    k = pl.program_id(1)

    @pl.when(k == 0)
    def _():
        acc_ref[...] = jnp.zeros_like(acc_ref)

    acc_ref[...] += jnp.dot(a_ref[...], xw_ref[...],
                            preferred_element_type=jnp.float32)

    @pl.when(k == pl.num_programs(1) - 1)
    def _():
        o_ref[...] = jnp.maximum(acc_ref[...] + b_ref[...],
                                 0.0).astype(o_ref.dtype)


def _aggregate(a_p, xw, b, *, tile, out_dtype, vmem_limit):
    n_p = a_p.shape[0]
    f_out_p = xw.shape[1]
    return pl.pallas_call(
        _aggregate_kernel,
        out_shape=jax.ShapeDtypeStruct((n_p, f_out_p), out_dtype),
        grid=(n_p // tile, n_p // tile),
        in_specs=[pl.BlockSpec((tile, tile), lambda i, k: (i, k)),
                  pl.BlockSpec((tile, f_out_p), lambda i, k: (k, 0)),
                  pl.BlockSpec((1, f_out_p), lambda i, k: (0, 0))],
        out_specs=pl.BlockSpec((tile, f_out_p), lambda i, k: (i, 0)),
        scratch_shapes=[pltpu.VMEM((tile, f_out_p), jnp.float32)],
        compiler_params=pltpu.CompilerParams(
            dimension_semantics=("parallel", "arbitrary"),
            vmem_limit_bytes=vmem_limit),
    )(a_p, xw, b)


# ---------------------------------------------------------------------------
# Encoder wrapper (padding, mode selection, layer loop)
# ---------------------------------------------------------------------------
def _fused_fits_vmem(n_p, feat_p, compute_dtype, budget_bytes):
    isz = jnp.dtype(compute_dtype).itemsize
    fmax = max(feat_p)
    a_bytes = n_p * n_p * isz
    x_bytes = n_p * feat_p[0] * isz
    w_bytes = sum(fi * fo * isz for fi, fo in zip(feat_p[:-1], feat_p[1:]))
    b_bytes = sum(SUBLANE * f * 4 for f in feat_p[1:])
    out_bytes = n_p * feat_p[-1] * 4
    # live intermediates inside the kernel: h (compute), xw (f32), relu (f32)
    act_bytes = n_p * fmax * (isz + 4 + 4)
    margin = 2 << 20                      # Mosaic internal scratch headroom
    total = a_bytes + x_bytes + w_bytes + b_bytes + out_bytes + act_bytes + margin
    return total <= budget_bytes


def encoder_forward(params, x, a_norm, *, mode="auto", tile=512,
                    compute_dtype=jnp.bfloat16):
    """k-layer GCN encoder. params: list of (W [f_in, f_out], b [f_out])."""
    n, f_in = x.shape
    out_channels = params[-1][0].shape[1]

    feat = [f_in] + [w.shape[1] for (w, _) in params]
    feat_p = [_round_up(f, LANE) for f in feat]        # lane-dense feature dims

    params_p = []
    for i, (w, b) in enumerate(params):
        wp = _pad2d(w, feat_p[i], feat_p[i + 1]).astype(compute_dtype)
        bp = _pad2d(b.reshape(1, -1), 1, feat_p[i + 1]).astype(jnp.float32)
        params_p.append((wp, bp))

    cap = _vmem_capacity_bytes()

    if mode == "auto":
        n_p_fused = _round_up(max(n, SUBLANE), SUBLANE)
        mode = ("fused"
                if _fused_fits_vmem(n_p_fused, feat_p, compute_dtype,
                                    int(0.7 * cap))
                else "tiled")

    if mode == "fused":
        n_p = _round_up(max(n, SUBLANE), SUBLANE)
        a_p = _pad2d(a_norm, n_p, n_p).astype(compute_dtype)
        x_p = _pad2d(x, n_p, feat_p[0]).astype(compute_dtype)
        out = _fused_encoder(a_p, x_p, params_p, compute_dtype,
                             vmem_limit=int(0.85 * cap))
    else:
        tile_eff = min(tile, _round_up(n, LANE))       # tile_n == tile_k
        n_p = _round_up(n, tile_eff)
        a_p = _pad2d(a_norm, n_p, n_p).astype(compute_dtype)
        h = _pad2d(x, n_p, feat_p[0]).astype(compute_dtype)
        vmem_limit = int(0.7 * cap)
        num_layers = len(params_p)
        for li, (wp, bp) in enumerate(params_p):
            f_in_p, f_out_p = wp.shape
            out_dtype = jnp.float32 if li == num_layers - 1 else compute_dtype
            if f_in_p <= f_out_p:
                # Y = ReLU((A @ H) @ W + b): W multiply fused into epilogue.
                h = _aggregate_fused_w(a_p, h, wp, bp, tile=tile_eff,
                                       out_dtype=out_dtype,
                                       vmem_limit=vmem_limit)
            else:
                # Wide input: hoist XW = H @ W once, then aggregate.
                xw = _tiled_matmul(h, wp, tm=tile_eff,
                                   out_dtype=compute_dtype,
                                   vmem_limit=vmem_limit)
                h = _aggregate(a_p, xw, bp, tile=tile_eff,
                               out_dtype=out_dtype, vmem_limit=vmem_limit)
        out = h

    return out[:n, :out_channels]


# ---------------------------------------------------------------------------
# Graph glue (plain JAX): dense symmetric-normalized adjacency with self loops
# ---------------------------------------------------------------------------
def build_norm_adjacency(edge_index, num_nodes):
    """D^{-1/2} (A + I) D^{-1/2}; edge_index int32 [2, E] = (src, dst)."""
    src, dst = edge_index[0], edge_index[1]
    adj = jnp.zeros((num_nodes, num_nodes), jnp.float32).at[dst, src].set(1.0)
    adj = jnp.maximum(adj, jnp.eye(num_nodes, dtype=jnp.float32))
    deg = adj.sum(axis=1)
    d_inv_sqrt = jnp.where(deg > 0, 1.0 / jnp.sqrt(deg), 0.0)
    return d_inv_sqrt[:, None] * adj * d_inv_sqrt[None, :]


def init_encoder_params(key, in_channels, out_channels, k=2):
    assert k >= 2
    dims = [in_channels] + [2 * out_channels] * (k - 1) + [out_channels]
    params = []
    for i in range(k):
        key, wk = jax.random.split(key)
        fan_in, fan_out = dims[i], dims[i + 1]
        scale = jnp.sqrt(6.0 / (fan_in + fan_out))        # glorot-uniform
        w = jax.random.uniform(wk, (fan_in, fan_out), jnp.float32, -scale, scale)
        b = jnp.zeros((fan_out,), jnp.float32)
        params.append((w, b))
    return params


def encoder_reference(params, x, a_norm):
    for (w, b) in params:
        x = jnp.maximum(a_norm @ (x @ w) + b[None, :], 0.0)
    return x


def _rel_err(a, b):
    return float(jnp.linalg.norm(a - b) / (jnp.linalg.norm(b) + 1e-12))


# ---------------------------------------------------------------------------
if __name__ == "__main__":
    key = jax.random.PRNGKey(0)

    in_channels = 32
    out_channels = 32          # hidden = 2 * out_channels = 64
    k = 2

    k_x, k_e, k_x2, k_e2, k_x3, k_e3, k_p, k_p3 = jax.random.split(key, 8)
    params = init_encoder_params(k_p, in_channels, out_channels, k=k)

    # ---- shipped size: single fused kernel (no grid, no HBM round-trip) ----
    N, E = 128, 512
    x = jax.random.normal(k_x, (N, in_channels), jnp.float32)
    edge_index = jax.random.randint(k_e, (2, E), 0, N, dtype=jnp.int32)
    a_norm = build_norm_adjacency(edge_index, N)
    ref = encoder_reference(params, x, a_norm)

    # f32 compute: tight reference check
    out_f32 = jax.block_until_ready(
        encoder_forward(params, x, a_norm, mode="fused",
                        compute_dtype=jnp.float32))
    assert out_f32.shape == (N, out_channels), out_f32.shape
    assert jnp.allclose(out_f32, ref, atol=1e-4, rtol=1e-4), \
        "fused f32 kernel mismatch vs reference"

    # bf16 compute (default fast path): loose relative-error check
    out_bf16 = jax.block_until_ready(
        encoder_forward(params, x, a_norm, mode="fused"))
    assert out_bf16.shape == (N, out_channels), out_bf16.shape
    assert _rel_err(out_bf16, ref) < 5e-2, \
        f"fused bf16 kernel rel err too large: {_rel_err(out_bf16, ref)}"

    # ---- larger graph: tiled path (fused-W aggregation, K-tiled accum) -----
    N2, E2 = 256, 2048
    x2 = jax.random.normal(k_x2, (N2, in_channels), jnp.float32)
    edge_index2 = jax.random.randint(k_e2, (2, E2), 0, N2, dtype=jnp.int32)
    a_norm2 = build_norm_adjacency(edge_index2, N2)
    ref2 = encoder_reference(params, x2, a_norm2)

    # small tiles to exercise multi-step row/K grid + accumulator init/final
    out_t_f32 = jax.block_until_ready(
        encoder_forward(params, x2, a_norm2, mode="tiled", tile=128,
                        compute_dtype=jnp.float32))
    assert out_t_f32.shape == (N2, out_channels), out_t_f32.shape
    assert jnp.allclose(out_t_f32, ref2, atol=5e-4, rtol=5e-4), \
        "tiled f32 kernel mismatch vs reference"

    # default tiles + bf16 (the production-default configuration)
    out_t_bf16 = jax.block_until_ready(
        encoder_forward(params, x2, a_norm2, mode="tiled"))
    assert out_t_bf16.shape == (N2, out_channels), out_t_bf16.shape
    assert _rel_err(out_t_bf16, ref2) < 5e-2, \
        f"tiled bf16 kernel rel err too large: {_rel_err(out_t_bf16, ref2)}"

    # ---- wide input features: exercises the hoisted-XW (B2) layer path -----
    N3, E3, in3 = 128, 512, 160      # 160 pads to 256 > 128 -> hoist path
    params3 = init_encoder_params(k_p3, in3, out_channels, k=k)
    x3 = jax.random.normal(k_x3, (N3, in3), jnp.float32)
    edge_index3 = jax.random.randint(k_e3, (2, E3), 0, N3, dtype=jnp.int32)
    a_norm3 = build_norm_adjacency(edge_index3, N3)
    ref3 = encoder_reference(params3, x3, a_norm3)

    out3 = jax.block_until_ready(
        encoder_forward(params3, x3, a_norm3, mode="tiled",
                        compute_dtype=jnp.float32))
    assert out3.shape == (N3, out_channels), out3.shape
    assert jnp.allclose(out3, ref3, atol=5e-4, rtol=5e-4), \
        "tiled (hoisted XW) kernel mismatch vs reference"

    print("KERNEL_OK")
</pallas_src>

<mosaic_0001>
module attributes {stable_mosaic.version = 11 : i64} {
  func.func @kernel(%arg0: memref<128x128xf32, #tpu.memory_space<vmem>>, %arg1: memref<128x128xf32, #tpu.memory_space<vmem>>, %arg2: memref<128x128xf32, #tpu.memory_space<vmem>>, %arg3: memref<1x128xf32, #tpu.memory_space<vmem>>, %arg4: memref<128x128xf32, #tpu.memory_space<vmem>>, %arg5: memref<1x128xf32, #tpu.memory_space<vmem>>, %arg6: memref<128x128xf32, #tpu.memory_space<vmem>>) attributes {dimension_semantics = [], scalar_prefetch = 0 : i64, scratch_operands = 0 : i64, tpu.core_type = #tpu.core_type<tc>} {
    %c0 = arith.constant 0 : index
    %c0_0 = arith.constant 0 : index
    %0 = vector.load %arg0[%c0, %c0_0] : memref<128x128xf32, #tpu.memory_space<vmem>>, vector<128x128xf32>
    %c0_1 = arith.constant 0 : index
    %c0_2 = arith.constant 0 : index
    %1 = vector.load %arg1[%c0_1, %c0_2] : memref<128x128xf32, #tpu.memory_space<vmem>>, vector<128x128xf32>
    %c0_3 = arith.constant 0 : index
    %c0_4 = arith.constant 0 : index
    %2 = vector.load %arg2[%c0_3, %c0_4] : memref<128x128xf32, #tpu.memory_space<vmem>>, vector<128x128xf32>
    %c0_5 = arith.constant 0 : index
    %c0_6 = arith.constant 0 : index
    %3 = vector.load %arg3[%c0_5, %c0_6] : memref<1x128xf32, #tpu.memory_space<vmem>>, vector<1x128xf32>
    %cst = arith.constant dense<0.000000e+00> : vector<128x128xf32>
    %4 = tpu.matmul %1, %2, %cst {dimension_numbers = #tpu.dot_dimension_numbers<[1], [0], [0], [1], [0, 0, 1, 1], [], []>} : vector<128x128xf32>, vector<128x128xf32>, vector<128x128xf32> -> vector<128x128xf32>
    %cst_7 = arith.constant dense<0.000000e+00> : vector<128x128xf32>
    %5 = tpu.matmul %0, %4, %cst_7 {dimension_numbers = #tpu.dot_dimension_numbers<[1], [0], [0], [1], [0, 0, 1, 1], [], []>} : vector<128x128xf32>, vector<128x128xf32>, vector<128x128xf32> -> vector<128x128xf32>
    %6 = vector.broadcast %3 : vector<1x128xf32> to vector<128x128xf32>
    %7 = arith.addf %5, %6 : vector<128x128xf32>
    %cst_8 = arith.constant 0.000000e+00 : f32
    %8 = vector.broadcast %cst_8 : f32 to vector<128x128xf32>
    %9 = arith.maximumf %7, %8 : vector<128x128xf32>
    %c0_9 = arith.constant 0 : index
    %c0_10 = arith.constant 0 : index
    %10 = vector.load %arg4[%c0_9, %c0_10] : memref<128x128xf32, #tpu.memory_space<vmem>>, vector<128x128xf32>
    %c0_11 = arith.constant 0 : index
    %c0_12 = arith.constant 0 : index
    %11 = vector.load %arg5[%c0_11, %c0_12] : memref<1x128xf32, #tpu.memory_space<vmem>>, vector<1x128xf32>
    %cst_13 = arith.constant dense<0.000000e+00> : vector<128x128xf32>
    %12 = tpu.matmul %9, %10, %cst_13 {dimension_numbers = #tpu.dot_dimension_numbers<[1], [0], [0], [1], [0, 0, 1, 1], [], []>} : vector<128x128xf32>, vector<128x128xf32>, vector<128x128xf32> -> vector<128x128xf32>
    %cst_14 = arith.constant dense<0.000000e+00> : vector<128x128xf32>
    %13 = tpu.matmul %0, %12, %cst_14 {dimension_numbers = #tpu.dot_dimension_numbers<[1], [0], [0], [1], [0, 0, 1, 1], [], []>} : vector<128x128xf32>, vector<128x128xf32>, vector<128x128xf32> -> vector<128x128xf32>
    %14 = vector.broadcast %11 : vector<1x128xf32> to vector<128x128xf32>
    %15 = arith.addf %13, %14 : vector<128x128xf32>
    %cst_15 = arith.constant 0.000000e+00 : f32
    %16 = vector.broadcast %cst_15 : f32 to vector<128x128xf32>
    %17 = arith.maximumf %15, %16 : vector<128x128xf32>
    %c0_16 = arith.constant 0 : index
    %c0_17 = arith.constant 0 : index
    %18 = vector.load %arg6[%c0_16, %c0_17] : memref<128x128xf32, #tpu.memory_space<vmem>>, vector<128x128xf32>
    tpu.vector_store %arg6[%c0_16, %c0_17], %17 {strides = array<i32>} : memref<128x128xf32, #tpu.memory_space<vmem>>, vector<128x128xf32>,
    return
  }
}

</mosaic_0001>

<bundles_post_ra>
// kernel: tpu_custom_call.1
= control target key start
LH: loop header
LB: loop body
LE: loop exit
PB: predicated region body
PF: predicated region fallthrough
CT: control target
= control target key end

     0   :  { %11 = vsyncpa [#allocation3], 0  ;;  %s1612_s0 = inlined_call_operand.hbm [shape: f32[128,128], index: 0, kind: input, shape index: {}]   ;;  %s1613_s1 = inlined_call_operand.hbm [shape: f32[128,128], index: 1, kind: input, shape index: {}]   ;;  %s1614_s2 = inlined_call_operand.hbm [shape: f32[128,128], index: 2, kind: input, shape index: {}]   ;;  %s1615_s3 = inlined_call_operand.vmem [shape: f32[1,128], index: 3, kind: input, shape index: {}]   ;;  %s1616_s4 = inlined_call_operand.hbm [shape: f32[128,128], index: 4, kind: input, shape index: {}]   ;;  %s1617_s5 = inlined_call_operand.vmem [shape: f32[1,128], index: 5, kind: input, shape index: {}]   ;;  %s1618_s6 = inlined_call_operand.hbm [shape: f32[128,128], index: 6, kind: output, shape index: {}]  }
   0x1   :  { %12 = vsyncpa [#allocation6], 0 }
   0x2   :  { %13 = vsyncpa [#allocation9], 0 }
   0x3   :  { %14 = vsyncpa [#allocation4], 0  ;;  %s1411_s21 = smov [#allocation5]   ;;  %s1412_s23 = smov [#allocation2]  }
   0x4   :  { %s32_s22 = sshll.u32 %s1411_s21, 4  ;;  %s20_s24 = sshll.u32 %s1412_s23, 4  ;;  %s33_s22 = int_to_ptr.vmem [resolvable:$true] %s32_s22  ;;  %s1453_s24 = int_to_ptr.vmem [resolvable:$true] %s20_s24 }
   0x5   :  { %s1293_s27 = scalar_lea.hbm %s1613_s1, 2048 }
   0x6   :  { %p1294_p0 = scmp.ne.s32.totalorder %s1613_s1, %s1293_s27  ;;  %p1297_p1 = scmp.lt.u32.totalorder %s1293_s27, %s1613_s1 }
   0x8   :  { %p1299_p2 = pnand %p1297_p1, %p1294_p0 }
   0xa   :  { %1302 = shalt.err (!%p1299_p2)
}
   0xb   :  { %s1303_s8 = scalar_lea.vmem %s33_s22, 2048  ;;  %p1308_p4 = scmp.lt.s32.totalorder %s33_s22, %s33_s22 }
   0xc   :  { %p1304_p3 = scmp.ne.s32.totalorder %s33_s22, %s1303_s8  ;;  %p1309_p5 = scmp.lt.s32.totalorder %s1303_s8, %s1303_s8 }
   0xe   :  { %p1310_p6 = por %p1309_p5, %p1308_p4 }
  0x10   :  { %p1311_p7 = pnand %p1310_p6, %p1304_p3 }
  0x12   :  { %1314 = shalt.err (!%p1311_p7)
}
  0x13   :  { %s1413_s9 = smov 128   ;;  %s1414_s10 = smov 8  }
  0x14   :  { %38 = dma.hbm_to_vmem [thread:$0]  %s1613_s1, 2048, %s33_s22, [#allocation6], %s1413_s9, %s1413_s9, %s1414_s10  }
  0x15   :  { %s1315_s15 = scalar_lea.hbm %s1612_s0, 2048 }
  0x16   :  { %p1316_p8 = scmp.ne.s32.totalorder %s1612_s0, %s1315_s15  ;;  %p1319_p9 = scmp.lt.u32.totalorder %s1315_s15, %s1612_s0 }
  0x18   :  { %p1321_p10 = pnand %p1319_p9, %p1316_p8 }
  0x1a   :  { %1324 = shalt.err (!%p1321_p10)
}
  0x1b   :  { %s1325_s20 = scalar_lea.vmem %s1453_s24, 2048  ;;  %p1330_p12 = scmp.lt.s32.totalorder %s1453_s24, %s1453_s24 }
  0x1c   :  { %p1326_p11 = scmp.ne.s32.totalorder %s1453_s24, %s1325_s20  ;;  %p1331_p13 = scmp.lt.s32.totalorder %s1325_s20, %s1325_s20 }
  0x1e   :  { %p1332_p0 = por %p1331_p13, %p1330_p12 }
  0x20   :  { %p1333_p1 = pnand %p1332_p0, %p1326_p11 }
  0x22   :  { %1336 = shalt.err (!%p1333_p1)
}
  0x23   :  { %26 = dma.hbm_to_vmem [thread:$0]  %s1612_s0, 2048, %s1453_s24, [#allocation3], %s1413_s9, %s1413_s9, %s1414_s10  }
  0x24   :  { %s1415_s22 = smov [#allocation7]   ;;  %s1416_s25 = smov [#allocation8]  }
  0x25   :  { %s44_s23 = sshll.u32 %s1415_s22, 4  ;;  %s58_s26 = sshll.u32 %s1416_s25, 4  ;;  %s45_s23 = int_to_ptr.vmem [resolvable:$true] %s44_s23  ;;  %s1490_s26 = int_to_ptr.vmem [resolvable:$true] %s58_s26 }
  0x26   :  { %s1337_s29 = scalar_lea.hbm %s1614_s2, 2048 }
  0x27   :  { %p1338_p2 = scmp.ne.s32.totalorder %s1614_s2, %s1337_s29  ;;  %p1341_p3 = scmp.lt.u32.totalorder %s1337_s29, %s1614_s2 }
  0x29   :  { %p1343_p4 = pnand %p1341_p3, %p1338_p2 }
  0x2b   :  { %1346 = shalt.err (!%p1343_p4)
}
  0x2c   :  { %s1347_s0 = scalar_lea.vmem %s45_s23, 2048  ;;  %p1352_p6 = scmp.lt.s32.totalorder %s45_s23, %s45_s23 }
  0x2d   :  { %p1348_p5 = scmp.ne.s32.totalorder %s45_s23, %s1347_s0  ;;  %p1353_p7 = scmp.lt.s32.totalorder %s1347_s0, %s1347_s0 }
  0x2f   :  { %p1354_p8 = por %p1353_p7, %p1352_p6 }
  0x31   :  { %p1355_p9 = pnand %p1354_p8, %p1348_p5 }
  0x33   :  { %1358 = shalt.err (!%p1355_p9)
}
  0x34   :  { %50 = dma.hbm_to_vmem [thread:$0]  %s1614_s2, 2048, %s45_s23, [#allocation6], %s1413_s9, %s1413_s9, %s1414_s10  }
  0x35   :  { %s1359_s15 = scalar_lea.hbm %s1616_s4, 2048 }
  0x36   :  { %p1360_p10 = scmp.ne.s32.totalorder %s1616_s4, %s1359_s15  ;;  %p1363_p11 = scmp.lt.u32.totalorder %s1359_s15, %s1616_s4 }
  0x38   :  { %p1365_p12 = pnand %p1363_p11, %p1360_p10 }
  0x3a   :  { %1368 = shalt.err (!%p1365_p12)
}
  0x3b   :  { %s1369_s20 = scalar_lea.vmem %s1490_s26, 2048  ;;  %p1374_p0 = scmp.lt.s32.totalorder %s1490_s26, %s1490_s26 }
  0x3c   :  { %p1370_p13 = scmp.ne.s32.totalorder %s1490_s26, %s1369_s20  ;;  %p1375_p1 = scmp.lt.s32.totalorder %s1369_s20, %s1369_s20 }
  0x3e   :  { %p1376_p2 = por %p1375_p1, %p1374_p0 }
  0x40   :  { %p1377_p3 = pnand %p1376_p2, %p1370_p13 }
  0x42   :  { %1380 = shalt.err (!%p1377_p3)
}
  0x43   :  { %64 = dma.hbm_to_vmem [thread:$0]  %s1616_s4, 2048, %s1490_s26, [#allocation9], %s1413_s9, %s1413_s9, %s1414_s10  }
  0x44   :  { %1403 = dma.done.wait [#allocation3], 2048  }
  0x45   :  { %1404 = vsyncadd [#allocation3], 4294965248 }
  0x46   :  { %1405 = dma.done.wait [#allocation6], 4096  }
  0x47   :  { %1406 = vsyncadd [#allocation6], 4294963200 }
  0x48   :  { %1407 = dma.done.wait [#allocation9], 2048  }
  0x49   :  { %1408 = vsyncadd [#allocation9], 4294965248  ;;  %v111_v0 = vld [vmem:[#allocation7] sm:$0xff]  ;;  %v112_v1 = vld [vmem:[#allocation7 + $0x8] sm:$0xff] }
  0x4a   :  { %v113_v2 = vld [vmem:[#allocation7 + $0x10] sm:$0xff]  ;;  %v1158_v3 = vpack.c.bf16 %v112_v1, %v111_v0  ;;  %v114_v4 = vld [vmem:[#allocation7 + $0x18] sm:$0xff]  ;;  %v115_v6 = vld [vmem:[#allocation7 + $0x20] sm:$0xff] }
  0x4b   :  { %v1162_v5 = vpack.c.bf16 %v114_v4, %v113_v2  ;;  %v116_v7 = vld [vmem:[#allocation7 + $0x28] sm:$0xff]  ;;  %v95_v9 = vld [vmem:[#allocation5] sm:$0xff]  ;;  %v117_v10 = vld [vmem:[#allocation7 + $0x30] sm:$0xff] }
  0x4c   :  { %1159 = vmatprep.subr.bf16.mxu0 %v1158_v3  ;;  %v1166_v8 = vpack.c.bf16 %v116_v7, %v115_v6  ;;  %v118_v11 = vld [vmem:[#allocation7 + $0x38] sm:$0xff]  ;;  %966 = vmatprep.mubr.f32.mxu0 %v95_v9  ;;  %v119_v13 = vld [vmem:[#allocation7 + $0x40] sm:$0xff]  ;;  %v120_v14 = vld [vmem:[#allocation7 + $0x48] sm:$0xff] }
  0x4d   :  { %1161 = vmatpush3.bf16.msra.mxu0 %v1158_v3  ;;  %v1170_v12 = vpack.c.bf16 %v118_v11, %v117_v10  ;;  %v1174_v15 = vpack.c.bf16 %v120_v14, %v119_v13  ;;  %v121_v16 = vld [vmem:[#allocation7 + $0x50] sm:$0xff]  ;;  %v122_v17 = vld [vmem:[#allocation7 + $0x58] sm:$0xff]  ;;  %v123_v19 = vld [vmem:[#allocation7 + $0x60] sm:$0xff] }
  0x4e   :  { %1163 = vmatprep.subr.bf16.mxu0 %v1162_v5  ;;  %v1178_v18 = vpack.c.bf16 %v122_v17, %v121_v16  ;;  %v124_v20 = vld [vmem:[#allocation7 + $0x68] sm:$0xff]  ;;  %v125_v22 = vld [vmem:[#allocation7 + $0x70] sm:$0xff]  ;;  %v126_v23 = vld [vmem:[#allocation7 + $0x78] sm:$0xff] }
  0x4f   :  { %v1182_v21 = vpack.c.bf16 %v124_v20, %v123_v19  ;;  %v1186_v24 = vpack.c.bf16 %v126_v23, %v125_v22  ;;  %v96_v25 = vld [vmem:[#allocation5 + $0x8] sm:$0xff]  ;;  %v97_v26 = vld [vmem:[#allocation5 + $0x10] sm:$0xff]  ;;  %v98_v27 = vld [vmem:[#allocation5 + $0x18] sm:$0xff] }
  0x50   :  { %v99_v28 = vld [vmem:[#allocation5 + $0x20] sm:$0xff]  ;;  %v100_v29 = vld [vmem:[#allocation5 + $0x28] sm:$0xff]  ;;  %v101_v30 = vld [vmem:[#allocation5 + $0x30] sm:$0xff] }
  0x51   :  { %1165 = vmatpush3.bf16.msra.mxu0 %v1162_v5  ;;  %v102_v31 = vld [vmem:[#allocation5 + $0x38] sm:$0xff]  ;;  %v103_v32 = vld [vmem:[#allocation5 + $0x40] sm:$0xff]  ;;  %v104_v33 = vld [vmem:[#allocation5 + $0x48] sm:$0xff] }
  0x52   :  { %1167 = vmatprep.subr.bf16.mxu0 %v1166_v8  ;;  %v105_v34 = vld [vmem:[#allocation5 + $0x50] sm:$0xff]  ;;  %v106_v35 = vld [vmem:[#allocation5 + $0x58] sm:$0xff]  ;;  %v107_v36 = vld [vmem:[#allocation5 + $0x60] sm:$0xff] }
  0x53   :  { %v108_v37 = vld [vmem:[#allocation5 + $0x68] sm:$0xff]  ;;  %v109_v38 = vld [vmem:[#allocation5 + $0x70] sm:$0xff]  ;;  %v110_v39 = vld [vmem:[#allocation5 + $0x78] sm:$0xff] }
  0x54   :  { %v1527_v40 = vld [vmem:[#allocation2] sm:$0xff]  ;;  %v441_v42 = vld [vmem:[#allocation8 + $0x8] sm:$0xff]  ;;  %v442_v43 = vld [vmem:[#allocation8 + $0x10] sm:$0xff] }
  0x55   :  { %1169 = vmatpush3.bf16.msra.mxu0 %v1166_v8  ;;  %1022 = vmatprep.mubr.f32.mxu1 %v1527_v40  ;;  %v440_v41 = vld [vmem:[#allocation8] sm:$0xff]  ;;  %v443_v45 = vld [vmem:[#allocation8 + $0x18] sm:$0xff]  ;;  %v445_v48 = vld [vmem:[#allocation8 + $0x28] sm:$0xff] }
  0x56   :  { %1171 = vmatprep.subr.bf16.mxu0 %v1170_v12  ;;  %v1222_v44 = vpack.c.bf16 %v441_v42, %v440_v41  ;;  %v1226_v46 = vpack.c.bf16 %v443_v45, %v442_v43  ;;  %v444_v47 = vld [vmem:[#allocation8 + $0x20] sm:$0xff]  ;;  %v446_v50 = vld [vmem:[#allocation8 + $0x30] sm:$0xff]  ;;  %v447_v51 = vld [vmem:[#allocation8 + $0x38] sm:$0xff] }
  0x57   :  { %v1230_v49 = vpack.c.bf16 %v445_v48, %v444_v47  ;;  %v1234_v52 = vpack.c.bf16 %v447_v51, %v446_v50  ;;  %v448_v53 = vld [vmem:[#allocation8 + $0x40] sm:$0xff]  ;;  %v449_v54 = vld [vmem:[#allocation8 + $0x48] sm:$0xff]  ;;  %v450_v56 = vld [vmem:[#allocation8 + $0x50] sm:$0xff] }
  0x58   :  { %v1238_v55 = vpack.c.bf16 %v449_v54, %v448_v53  ;;  %v451_v57 = vld [vmem:[#allocation8 + $0x58] sm:$0xff]  ;;  %v452_v59 = vld [vmem:[#allocation8 + $0x60] sm:$0xff]  ;;  %v453_v60 = vld [vmem:[#allocation8 + $0x68] sm:$0xff] }
  0x59   :  { %1173 = vmatpush3.bf16.msra.mxu0 %v1170_v12  ;;  %v1242_v58 = vpack.c.bf16 %v451_v57, %v450_v56  ;;  %v1246_v61 = vpack.c.bf16 %v453_v60, %v452_v59  ;;  %v1530_v22 = vld [vmem:[#allocation2 + $0x8] sm:$0xff]  ;;  %v1532_v23 = vld [vmem:[#allocation2 + $0x10] sm:$0xff]  ;;  %v804_v41 = vld [vmem:[%s1615_s3] ss:$0 sm:$0xff] }
  0x5a   :  { %1175 = vmatprep.subr.bf16.mxu0 %v1174_v15 }
  0x5d   :  { %1177 = vmatpush3.bf16.msra.mxu0 %v1174_v15 }
  0x5e   :  { %1179 = vmatprep.subr.bf16.mxu0 %v1178_v18 }
  0x61   :  { %1181 = vmatpush3.bf16.msra.mxu0 %v1178_v18 }
  0x62   :  { %1183 = vmatprep.subr.bf16.mxu0 %v1182_v21 }
  0x65   :  { %1185 = vmatpush3.bf16.msra.mxu0 %v1182_v21 }
  0x66   :  { %1187 = vmatprep.subr.bf16.mxu0 %v1186_v24 }
  0x69   :  { %1189 = vmatpush3.bf16.msra.mxu0 %v1186_v24  ;;  %v1536_v24 = vld [vmem:[#allocation2 + $0x18] sm:$0xff] }
  0x6a   :  { %1223 = vmatprep.subr.bf16.mxu0 %v1222_v44 }
  0x6c   :  { %967 = vmatmul.mubr.f32.vlgmr.msra.gmra.mrb[0].mxu0 %v96_v25  ;;  %v1538_v25 = vld [vmem:[#allocation2 + $0x20] sm:$0xff] }
  0x6d   :  { %969 = vmatprep.mubr.f32.mxu0 %v97_v26  ;;  %1225 = vmatpush3.bf16.msra.mxu0 %v1222_v44  ;;  %v1542_v26 = vld [vmem:[#allocation2 + $0x28] sm:$0xff] }
  0x6e   :  { %1227 = vmatprep.subr.bf16.mxu0 %v1226_v46 }
  0x70   :  { %970 = vmatmul.mubr.f32.gmra.mrb[2].mxu0 %v98_v27  ;;  %v1544_v27 = vld [vmem:[#allocation2 + $0x30] sm:$0xff] }
  0x71   :  { %972 = vmatprep.mubr.f32.mxu0 %v99_v28  ;;  %1229 = vmatpush3.bf16.msra.mxu0 %v1226_v46  ;;  %v1548_v28 = vld [vmem:[#allocation2 + $0x38] sm:$0xff] }
  0x72   :  { %1231 = vmatprep.subr.bf16.mxu0 %v1230_v49 }
  0x74   :  { %973 = vmatmul.mubr.f32.gmra.mrb[4].mxu0 %v100_v29  ;;  %v1550_v29 = vld [vmem:[#allocation2 + $0x40] sm:$0xff] }
  0x75   :  { %975 = vmatprep.mubr.f32.mxu0 %v101_v30  ;;  %1233 = vmatpush3.bf16.msra.mxu0 %v1230_v49  ;;  %v1554_v30 = vld [vmem:[#allocation2 + $0x48] sm:$0xff] }
  0x76   :  { %1235 = vmatprep.subr.bf16.mxu0 %v1234_v52 }
  0x78   :  { %976 = vmatmul.mubr.f32.gmra.mrb[6].mxu0 %v102_v31  ;;  %v1556_v31 = vld [vmem:[#allocation2 + $0x50] sm:$0xff] }
  0x79   :  { %978 = vmatprep.mubr.f32.mxu0 %v103_v32  ;;  %1237 = vmatpush3.bf16.msra.mxu0 %v1234_v52  ;;  %v1560_v32 = vld [vmem:[#allocation2 + $0x58] sm:$0xff] }
  0x7a   :  { %1239 = vmatprep.subr.bf16.mxu0 %v1238_v55 }
  0x7c   :  { %979 = vmatmul.mubr.f32.gmra.mrb[8].mxu0 %v104_v33  ;;  %v1562_v33 = vld [vmem:[#allocation2 + $0x60] sm:$0xff] }
  0x7d   :  { %981 = vmatprep.mubr.f32.mxu0 %v105_v34  ;;  %1241 = vmatpush3.bf16.msra.mxu0 %v1238_v55  ;;  %v1566_v34 = vld [vmem:[#allocation2 + $0x68] sm:$0xff] }
  0x7e   :  { %1243 = vmatprep.subr.bf16.mxu0 %v1242_v58 }
  0x80   :  { %982 = vmatmul.mubr.f32.gmra.mrb[10].mxu0 %v106_v35  ;;  %v1568_v35 = vld [vmem:[#allocation2 + $0x70] sm:$0xff] }
  0x81   :  { %984 = vmatprep.mubr.f32.mxu0 %v107_v36  ;;  %1245 = vmatpush3.bf16.msra.mxu0 %v1242_v58  ;;  %v1572_v36 = vld [vmem:[#allocation2 + $0x78] sm:$0xff] }
  0x82   :  { %1247 = vmatprep.subr.bf16.mxu0 %v1246_v61 }
  0x84   :  { %985 = vmatmul.mubr.f32.gmra.mrb[12].mxu0 %v108_v37  ;;  %v454_v37 = vld [vmem:[#allocation8 + $0x70] sm:$0xff] }
  0x85   :  { %987 = vmatprep.mubr.f32.mxu0 %v109_v38  ;;  %1249 = vmatpush3.bf16.msra.mxu0 %v1246_v61  ;;  %v455_v38 = vld [vmem:[#allocation8 + $0x78] sm:$0xff] }
  0x88   :  { %988 = vmatmul.mubr.f32.gmra.mrb[14].mxu0 %v110_v39  ;;  %v1250_v39 = vpack.c.bf16 %v455_v38, %v454_v37 }
  0x8a   :  { %1251 = vmatprep.subr.bf16.mxu0 %v1250_v39 }
  0x8b   :  { %1253 = vmatpush3.bf16.msra.mxu0 %v1250_v39 }
 0x13f   :  { %v968_v62 = vpop.f32.mrb[0].mxu0 }
 0x140   :  { %v194_v63 = vpop.f32.mrb[1].mxu0 }
 0x141   :  { %v1190_v0 = vpack.c.bf16 %v968_v62, %v194_v63 }
 0x143   :  { %v971_v1 = vpop.f32.mrb[2].mxu0  ;;  %1191 = vmatprep.subr.bf16.mxu1 %v1190_v0 }
 0x144   :  { %v204_v2 = vpop.f32.mrb[3].mxu0  ;;  %1193 = vmatpush3.bf16.msra.mxu1 %v1190_v0 }
 0x145   :  { %v1194_v3 = vpack.c.bf16 %v971_v1, %v204_v2 }
 0x147   :  { %v974_v4 = vpop.f32.mrb[4].mxu0  ;;  %1195 = vmatprep.subr.bf16.mxu1 %v1194_v3 }
 0x148   :  { %v214_v5 = vpop.f32.mrb[5].mxu0  ;;  %1197 = vmatpush3.bf16.msra.mxu1 %v1194_v3 }
 0x149   :  { %v1198_v6 = vpack.c.bf16 %v974_v4, %v214_v5 }
 0x14b   :  { %v977_v7 = vpop.f32.mrb[6].mxu0  ;;  %1199 = vmatprep.subr.bf16.mxu1 %v1198_v6 }
 0x14c   :  { %v224_v8 = vpop.f32.mrb[7].mxu0  ;;  %1201 = vmatpush3.bf16.msra.mxu1 %v1198_v6 }
 0x14d   :  { %v1202_v9 = vpack.c.bf16 %v977_v7, %v224_v8 }
 0x14f   :  { %v980_v10 = vpop.f32.mrb[8].mxu0  ;;  %1203 = vmatprep.subr.bf16.mxu1 %v1202_v9 }
 0x150   :  { %v234_v11 = vpop.f32.mrb[9].mxu0  ;;  %1205 = vmatpush3.bf16.msra.mxu1 %v1202_v9 }
 0x151   :  { %v1206_v12 = vpack.c.bf16 %v980_v10, %v234_v11 }
 0x153   :  { %v983_v13 = vpop.f32.mrb[10].mxu0  ;;  %1207 = vmatprep.subr.bf16.mxu1 %v1206_v12 }
 0x154   :  { %v244_v14 = vpop.f32.mrb[11].mxu0  ;;  %1209 = vmatpush3.bf16.msra.mxu1 %v1206_v12 }
 0x155   :  { %v1210_v15 = vpack.c.bf16 %v983_v13, %v244_v14 }
 0x157   :  { %v986_v16 = vpop.f32.mrb[12].mxu0  ;;  %1211 = vmatprep.subr.bf16.mxu1 %v1210_v15 }
 0x158   :  { %v254_v17 = vpop.f32.mrb[13].mxu0  ;;  %1213 = vmatpush3.bf16.msra.mxu1 %v1210_v15 }
 0x159   :  { %v1214_v18 = vpack.c.bf16 %v986_v16, %v254_v17 }
 0x15b   :  { %v989_v19 = vpop.f32.mrb[14].mxu0  ;;  %1215 = vmatprep.subr.bf16.mxu1 %v1214_v18 }
 0x15c   :  { %v264_v20 = vpop.f32.mrb[15].mxu0  ;;  %1217 = vmatpush3.bf16.msra.mxu1 %v1214_v18 }
 0x15d   :  { %v1218_v21 = vpack.c.bf16 %v989_v19, %v264_v20 }
 0x15f   :  { %1219 = vmatprep.subr.bf16.mxu1 %v1218_v21 }
 0x160   :  { %1221 = vmatpush3.bf16.msra.mxu1 %v1218_v21 }
 0x163   :  { %1023 = vmatmul.mubr.f32.vlgmr.msra.gmra.mrb[0].mxu1 %v1530_v22 }
 0x164   :  { %1025 = vmatprep.mubr.f32.mxu1 %v1532_v23 }
 0x167   :  { %1026 = vmatmul.mubr.f32.gmra.mrb[2].mxu1 %v1536_v24 }
 0x168   :  { %1028 = vmatprep.mubr.f32.mxu1 %v1538_v25 }
 0x16b   :  { %1029 = vmatmul.mubr.f32.gmra.mrb[4].mxu1 %v1542_v26 }
 0x16c   :  { %1031 = vmatprep.mubr.f32.mxu1 %v1544_v27 }
 0x16f   :  { %1032 = vmatmul.mubr.f32.gmra.mrb[6].mxu1 %v1548_v28 }
 0x170   :  { %1034 = vmatprep.mubr.f32.mxu1 %v1550_v29 }
 0x173   :  { %1035 = vmatmul.mubr.f32.gmra.mrb[8].mxu1 %v1554_v30 }
 0x174   :  { %1037 = vmatprep.mubr.f32.mxu1 %v1556_v31 }
 0x177   :  { %1038 = vmatmul.mubr.f32.gmra.mrb[10].mxu1 %v1560_v32 }
 0x178   :  { %1040 = vmatprep.mubr.f32.mxu1 %v1562_v33 }
 0x17b   :  { %1041 = vmatmul.mubr.f32.gmra.mrb[12].mxu1 %v1566_v34 }
 0x17c   :  { %1043 = vmatprep.mubr.f32.mxu1 %v1568_v35 }
 0x17f   :  { %1044 = vmatmul.mubr.f32.gmra.mrb[14].mxu1 %v1572_v36 }
 0x180   :  { %1134 = vmatprep.mubr.f32.mxu1 %v1527_v40 }
 0x236   :  { %v1024_v42 = vpop.f32.mrb[0].mxu1 }
 0x237   :  { %v351_v43 = vadd.f32 %v1024_v42, %v804_v41  ;;  %v345_v44 = vpop.f32.mrb[1].mxu1 }
 0x238   :  { %v346_v45 = vadd.f32 %v804_v41, %v345_v44 }
 0x239   :  { %v425_v48 = vmax.f32 %v351_v43, 0.0 }
 0x23a   :  { %v424_v46 = vmax.f32 %v346_v45, 0.0  ;;  %v1027_v47 = vpop.f32.mrb[2].mxu1 }
 0x23b   :  { %v361_v49 = vadd.f32 %v1027_v47, %v804_v41  ;;  %v355_v50 = vpop.f32.mrb[3].mxu1 }
 0x23c   :  { %v356_v51 = vadd.f32 %v804_v41, %v355_v50  ;;  %1078 = vmatprep.mubr.f32.mxu0 %v424_v46 }
 0x23d   :  { %1079 = vmatmul.mubr.f32.vlgmr.msra.gmra.mrb[16].mxu0 %v425_v48  ;;  %v427_v53 = vmax.f32 %v361_v49, 0.0 }
 0x23e   :  { %v426_v40 = vmax.f32 %v356_v51, 0.0  ;;  %v1030_v52 = vpop.f32.mrb[4].mxu1 }
 0x23f   :  { %v371_v54 = vadd.f32 %v1030_v52, %v804_v41  ;;  %v365_v55 = vpop.f32.mrb[5].mxu1 }
 0x240   :  { %v366_v56 = vadd.f32 %v804_v41, %v365_v55  ;;  %1081 = vmatprep.mubr.f32.mxu0 %v426_v40 }
 0x241   :  { %1082 = vmatmul.mubr.f32.gmra.mrb[18].mxu0 %v427_v53  ;;  %v429_v59 = vmax.f32 %v371_v54, 0.0 }
 0x242   :  { %v428_v57 = vmax.f32 %v366_v56, 0.0  ;;  %v1033_v58 = vpop.f32.mrb[6].mxu1 }
 0x243   :  { %v381_v60 = vadd.f32 %v1033_v58, %v804_v41  ;;  %v375_v61 = vpop.f32.mrb[7].mxu1 }
 0x244   :  { %v376_v62 = vadd.f32 %v804_v41, %v375_v61  ;;  %1084 = vmatprep.mubr.f32.mxu0 %v428_v57 }
 0x245   :  { %1085 = vmatmul.mubr.f32.gmra.mrb[20].mxu0 %v429_v59  ;;  %v431_v1 = vmax.f32 %v381_v60, 0.0 }
 0x246   :  { %v430_v63 = vmax.f32 %v376_v62, 0.0  ;;  %v1036_v0 = vpop.f32.mrb[8].mxu1 }
 0x247   :  { %v391_v2 = vadd.f32 %v1036_v0, %v804_v41  ;;  %v385_v3 = vpop.f32.mrb[9].mxu1 }
 0x248   :  { %v386_v4 = vadd.f32 %v804_v41, %v385_v3  ;;  %1087 = vmatprep.mubr.f32.mxu0 %v430_v63 }
 0x249   :  { %1088 = vmatmul.mubr.f32.gmra.mrb[22].mxu0 %v431_v1  ;;  %v433_v7 = vmax.f32 %v391_v2, 0.0 }
 0x24a   :  { %v432_v5 = vmax.f32 %v386_v4, 0.0  ;;  %v1039_v6 = vpop.f32.mrb[10].mxu1 }
 0x24b   :  { %v401_v8 = vadd.f32 %v1039_v6, %v804_v41  ;;  %v395_v9 = vpop.f32.mrb[11].mxu1 }
 0x24c   :  { %v396_v10 = vadd.f32 %v804_v41, %v395_v9  ;;  %1090 = vmatprep.mubr.f32.mxu0 %v432_v5 }
 0x24d   :  { %1091 = vmatmul.mubr.f32.gmra.mrb[24].mxu0 %v433_v7  ;;  %v435_v13 = vmax.f32 %v401_v8, 0.0 }
 0x24e   :  { %v434_v11 = vmax.f32 %v396_v10, 0.0  ;;  %v1042_v12 = vpop.f32.mrb[12].mxu1 }
 0x24f   :  { %v411_v14 = vadd.f32 %v1042_v12, %v804_v41  ;;  %v405_v15 = vpop.f32.mrb[13].mxu1 }
 0x250   :  { %v406_v16 = vadd.f32 %v804_v41, %v405_v15  ;;  %1093 = vmatprep.mubr.f32.mxu0 %v434_v11 }
 0x251   :  { %1094 = vmatmul.mubr.f32.gmra.mrb[26].mxu0 %v435_v13  ;;  %v437_v19 = vmax.f32 %v411_v14, 0.0 }
 0x252   :  { %v436_v17 = vmax.f32 %v406_v16, 0.0  ;;  %v1045_v18 = vpop.f32.mrb[14].mxu1 }
 0x253   :  { %v421_v20 = vadd.f32 %v1045_v18, %v804_v41  ;;  %v415_v21 = vpop.f32.mrb[15].mxu1 }
 0x254   :  { %v416_v37 = vadd.f32 %v804_v41, %v415_v21  ;;  %1096 = vmatprep.mubr.f32.mxu0 %v436_v17 }
 0x255   :  { %1097 = vmatmul.mubr.f32.gmra.mrb[28].mxu0 %v437_v19  ;;  %v439_v39 = vmax.f32 %v421_v20, 0.0 }
 0x256   :  { %v438_v38 = vmax.f32 %v416_v37, 0.0 }
 0x258   :  { %1099 = vmatprep.mubr.f32.mxu0 %v438_v38 }
 0x259   :  { %1100 = vmatmul.mubr.f32.gmra.mrb[30].mxu0 %v439_v39 }
 0x310   :  { %v1080_v42 = vpop.f32.mrb[16].mxu0 }
 0x311   :  { %v523_v43 = vpop.f32.mrb[17].mxu0 }
 0x312   :  { %v1254_v44 = vpack.c.bf16 %v1080_v42, %v523_v43 }
 0x314   :  { %v1083_v45 = vpop.f32.mrb[18].mxu0  ;;  %1255 = vmatprep.subr.bf16.mxu1 %v1254_v44 }
 0x315   :  { %v533_v46 = vpop.f32.mrb[19].mxu0  ;;  %1257 = vmatpush3.bf16.msra.mxu1 %v1254_v44 }
 0x316   :  { %v1258_v47 = vpack.c.bf16 %v1083_v45, %v533_v46 }
 0x318   :  { %v1086_v48 = vpop.f32.mrb[20].mxu0  ;;  %1259 = vmatprep.subr.bf16.mxu1 %v1258_v47 }
 0x319   :  { %v543_v49 = vpop.f32.mrb[21].mxu0  ;;  %1261 = vmatpush3.bf16.msra.mxu1 %v1258_v47 }
 0x31a   :  { %v1262_v50 = vpack.c.bf16 %v1086_v48, %v543_v49 }
 0x31c   :  { %v1089_v41 = vpop.f32.mrb[22].mxu0  ;;  %1263 = vmatprep.subr.bf16.mxu1 %v1262_v50 }
 0x31d   :  { %v553_v51 = vpop.f32.mrb[23].mxu0  ;;  %1265 = vmatpush3.bf16.msra.mxu1 %v1262_v50 }
 0x31e   :  { %v1266_v40 = vpack.c.bf16 %v1089_v41, %v553_v51 }
 0x320   :  { %v1092_v52 = vpop.f32.mrb[24].mxu0  ;;  %1267 = vmatprep.subr.bf16.mxu1 %v1266_v40 }
 0x321   :  { %v563_v53 = vpop.f32.mrb[25].mxu0  ;;  %1269 = vmatpush3.bf16.msra.mxu1 %v1266_v40 }
 0x322   :  { %v1270_v54 = vpack.c.bf16 %v1092_v52, %v563_v53 }
 0x324   :  { %v1095_v55 = vpop.f32.mrb[26].mxu0  ;;  %1271 = vmatprep.subr.bf16.mxu1 %v1270_v54 }
 0x325   :  { %v573_v56 = vpop.f32.mrb[27].mxu0  ;;  %1273 = vmatpush3.bf16.msra.mxu1 %v1270_v54 }
 0x326   :  { %v1274_v57 = vpack.c.bf16 %v1095_v55, %v573_v56 }
 0x328   :  { %v1098_v58 = vpop.f32.mrb[28].mxu0  ;;  %1275 = vmatprep.subr.bf16.mxu1 %v1274_v57 }
 0x329   :  { %v583_v59 = vpop.f32.mrb[29].mxu0  ;;  %1277 = vmatpush3.bf16.msra.mxu1 %v1274_v57 }
 0x32a   :  { %v1278_v60 = vpack.c.bf16 %v1098_v58, %v583_v59 }
 0x32c   :  { %v1101_v61 = vpop.f32.mrb[30].mxu0  ;;  %1279 = vmatprep.subr.bf16.mxu1 %v1278_v60 }
 0x32d   :  { %v593_v62 = vpop.f32.mrb[31].mxu0  ;;  %1281 = vmatpush3.bf16.msra.mxu1 %v1278_v60 }
 0x32e   :  { %v1282_v63 = vpack.c.bf16 %v1101_v61, %v593_v62 }
 0x330   :  { %1283 = vmatprep.subr.bf16.mxu1 %v1282_v63 }
 0x331   :  { %1285 = vmatpush3.bf16.msra.mxu1 %v1282_v63 }
 0x334   :  { %1135 = vmatmul.mubr.f32.vlgmr.msra.gmra.mrb[16].mxu1 %v1530_v22  ;;  %v805_v22 = vld [vmem:[%s1617_s5] ss:$0 sm:$0xff]  ;;  %s1417_s5 = smov [#allocation10]  }
 0x335   :  { %1137 = vmatprep.mubr.f32.mxu1 %v1532_v23  ;;  %s790_s23 = sshll.u32 %s1417_s5, 4  ;;  %s791_s23 = int_to_ptr.vmem [resolvable:$true] %s790_s23 }
 0x336   :  { %s1381_s25 = scalar_lea.vmem %s791_s23, 2048  ;;  %p1386_p5 = scmp.lt.s32.totalorder %s791_s23, %s791_s23 }
 0x337   :  { %p1382_p4 = scmp.ne.s32.totalorder %s791_s23, %s1381_s25  ;;  %p1387_p6 = scmp.lt.s32.totalorder %s1381_s25, %s1381_s25 }
 0x338   :  { %1138 = vmatmul.mubr.f32.gmra.mrb[18].mxu1 %v1536_v24 }
 0x339   :  { %1140 = vmatprep.mubr.f32.mxu1 %v1538_v25  ;;  %p1388_p7 = por %p1387_p6, %p1386_p5 }
 0x33b   :  { %p1389_p8 = pnand %p1388_p7, %p1382_p4 }
 0x33c   :  { %1141 = vmatmul.mubr.f32.gmra.mrb[20].mxu1 %v1542_v26 }
 0x33d   :  { %1143 = vmatprep.mubr.f32.mxu1 %v1544_v27 }
 0x340   :  { %1144 = vmatmul.mubr.f32.gmra.mrb[22].mxu1 %v1548_v28 }
 0x341   :  { %1146 = vmatprep.mubr.f32.mxu1 %v1550_v29 }
 0x344   :  { %1147 = vmatmul.mubr.f32.gmra.mrb[24].mxu1 %v1554_v30 }
 0x345   :  { %1149 = vmatprep.mubr.f32.mxu1 %v1556_v31 }
 0x348   :  { %1150 = vmatmul.mubr.f32.gmra.mrb[26].mxu1 %v1560_v32 }
 0x349   :  { %1152 = vmatprep.mubr.f32.mxu1 %v1562_v33 }
 0x34c   :  { %1153 = vmatmul.mubr.f32.gmra.mrb[28].mxu1 %v1566_v34 }
 0x34d   :  { %1155 = vmatprep.mubr.f32.mxu1 %v1568_v35 }
 0x350   :  { %1156 = vmatmul.mubr.f32.gmra.mrb[30].mxu1 %v1572_v36 }
 0x407   :  { %v1136_v23 = vpop.f32.mrb[16].mxu1 }
 0x408   :  { %v680_v24 = vadd.f32 %v1136_v23, %v805_v22  ;;  %v674_v25 = vpop.f32.mrb[17].mxu1 }
 0x409   :  { %v675_v26 = vadd.f32 %v805_v22, %v674_v25 }
 0x40a   :  { %v754_v27 = vmax.f32 %v680_v24, 0.0 }
 0x40b   :  { %v753_v28 = vmax.f32 %v675_v26, 0.0  ;;  %v1139_v29 = vpop.f32.mrb[18].mxu1 }
 0x40c   :  { %770 = vst [vmem:[#allocation10 + $0x8] sm:$0xff] %v754_v27  ;;  %v690_v30 = vadd.f32 %v1139_v29, %v805_v22  ;;  %v684_v31 = vpop.f32.mrb[19].mxu1 }
 0x40d   :  { %769 = vst [vmem:[#allocation10] sm:$0xff] %v753_v28  ;;  %v685_v32 = vadd.f32 %v805_v22, %v684_v31 }
 0x40e   :  { %v756_v33 = vmax.f32 %v690_v30, 0.0 }
 0x40f   :  { %v755_v34 = vmax.f32 %v685_v32, 0.0  ;;  %v1142_v35 = vpop.f32.mrb[20].mxu1 }
 0x410   :  { %772 = vst [vmem:[#allocation10 + $0x18] sm:$0xff] %v756_v33  ;;  %v700_v36 = vadd.f32 %v1142_v35, %v805_v22  ;;  %v694_v0 = vpop.f32.mrb[21].mxu1 }
 0x411   :  { %771 = vst [vmem:[#allocation10 + $0x10] sm:$0xff] %v755_v34  ;;  %v695_v1 = vadd.f32 %v805_v22, %v694_v0 }
 0x412   :  { %v758_v2 = vmax.f32 %v700_v36, 0.0 }
 0x413   :  { %v757_v3 = vmax.f32 %v695_v1, 0.0  ;;  %v1145_v4 = vpop.f32.mrb[22].mxu1 }
 0x414   :  { %774 = vst [vmem:[#allocation10 + $0x28] sm:$0xff] %v758_v2  ;;  %v710_v5 = vadd.f32 %v1145_v4, %v805_v22  ;;  %v704_v6 = vpop.f32.mrb[23].mxu1 }
 0x415   :  { %773 = vst [vmem:[#allocation10 + $0x20] sm:$0xff] %v757_v3  ;;  %v705_v7 = vadd.f32 %v805_v22, %v704_v6 }
 0x416   :  { %v760_v8 = vmax.f32 %v710_v5, 0.0 }
 0x417   :  { %v759_v9 = vmax.f32 %v705_v7, 0.0  ;;  %v1148_v10 = vpop.f32.mrb[24].mxu1 }
 0x418   :  { %776 = vst [vmem:[#allocation10 + $0x38] sm:$0xff] %v760_v8  ;;  %v720_v11 = vadd.f32 %v1148_v10, %v805_v22  ;;  %v714_v12 = vpop.f32.mrb[25].mxu1 }
 0x419   :  { %775 = vst [vmem:[#allocation10 + $0x30] sm:$0xff] %v759_v9  ;;  %v715_v13 = vadd.f32 %v805_v22, %v714_v12 }
 0x41a   :  { %v762_v14 = vmax.f32 %v720_v11, 0.0 }
 0x41b   :  { %v761_v15 = vmax.f32 %v715_v13, 0.0  ;;  %v1151_v16 = vpop.f32.mrb[26].mxu1 }
 0x41c   :  { %778 = vst [vmem:[#allocation10 + $0x48] sm:$0xff] %v762_v14  ;;  %v730_v17 = vadd.f32 %v1151_v16, %v805_v22  ;;  %v724_v18 = vpop.f32.mrb[27].mxu1 }
 0x41d   :  { %777 = vst [vmem:[#allocation10 + $0x40] sm:$0xff] %v761_v15  ;;  %v725_v19 = vadd.f32 %v805_v22, %v724_v18 }
 0x41e   :  { %v764_v20 = vmax.f32 %v730_v17, 0.0 }
 0x41f   :  { %v763_v21 = vmax.f32 %v725_v19, 0.0  ;;  %v1154_v37 = vpop.f32.mrb[28].mxu1 }
 0x420   :  { %780 = vst [vmem:[#allocation10 + $0x58] sm:$0xff] %v764_v20  ;;  %v740_v38 = vadd.f32 %v1154_v37, %v805_v22  ;;  %v734_v39 = vpop.f32.mrb[29].mxu1 }
 0x421   :  { %779 = vst [vmem:[#allocation10 + $0x50] sm:$0xff] %v763_v21  ;;  %v735_v42 = vadd.f32 %v805_v22, %v734_v39 }
 0x422   :  { %v766_v43 = vmax.f32 %v740_v38, 0.0 }
 0x423   :  { %v765_v44 = vmax.f32 %v735_v42, 0.0  ;;  %v1157_v45 = vpop.f32.mrb[30].mxu1 }
 0x424   :  { %782 = vst [vmem:[#allocation10 + $0x68] sm:$0xff] %v766_v43  ;;  %v750_v46 = vadd.f32 %v1157_v45, %v805_v22  ;;  %v744_v47 = vpop.f32.mrb[31].mxu1 }
 0x425   :  { %781 = vst [vmem:[#allocation10 + $0x60] sm:$0xff] %v765_v44  ;;  %v745_v48 = vadd.f32 %v805_v22, %v744_v47 }
 0x426   :  { %v768_v49 = vmax.f32 %v750_v46, 0.0 }
 0x427   :  { %v767_v50 = vmax.f32 %v745_v48, 0.0 }
 0x428   :  { %784 = vst [vmem:[#allocation10 + $0x78] sm:$0xff] %v768_v49 }
 0x429   :  { %783 = vst [vmem:[#allocation10 + $0x70] sm:$0xff] %v767_v50 }
 0x42a   :  { %1392 = shalt.err (!%p1389_p8)
}
 0x42b   :  { %s1393_s28 = scalar_lea.hbm %s1618_s6, 2048 }
 0x42c   :  { %p1394_p9 = scmp.ne.s32.totalorder %s1618_s6, %s1393_s28  ;;  %p1397_p10 = scmp.lt.u32.totalorder %s1393_s28, %s1618_s6 }
 0x42e   :  { %p1399_p11 = pnand %p1397_p10, %p1394_p9 }
 0x430   :  { %1402 = shalt.err (!%p1399_p11)
}
 0x431   :  { %796 = dma.vmem_to_hbm [thread:$0]  %s791_s23, 2048, %s1618_s6, [#allocation4], %s1413_s9, %s1413_s9, %s1414_s10  }
 0x432   :  { %1409 = dma.done.wait [#allocation4], 2048  }
 0x433   :  { %1410 = vsyncadd [#allocation4], 4294965248 }
 0x434   :  { %800 = vsyncpa [#allocation3], 1 }
 0x435   :  { %801 = vsyncpa [#allocation6], 1 }
 0x436   :  { %802 = vsyncpa [#allocation9], 1 }
 0x437   :  { %803 = vsyncpa [#allocation4], 1 }

</bundles_post_ra>
